<compile_context>
chip_gen: v7x
topology: tpu7x:2x2x1
jax: 0.10.0
libtpu: 0.0.40
codegen_flags: <defaults>
</compile_context>

<pallas_src>
import numpy as np
import jax
import jax.numpy as jnp
from jax import lax
from jax.experimental import pallas as pl
from jax.experimental.pallas import tpu as pltpu

EPS = 1e-5


def _pick_vmem_limit():
    """Per-generation scoped-VMEM budget (~48 MiB on v7x, ~96 MiB on v5e/v6e)."""
    try:
        cap = int(pltpu.get_tpu_info().vmem_capacity_bytes)
        return max(32 * 1024 * 1024, min(cap * 3 // 4, 96 * 1024 * 1024))
    except Exception:
        return 32 * 1024 * 1024


# --------------------------------------------------------------------------- #
# In-kernel 3x3 "same" convolution (stride 1) in channel-major (C, H*W) layout
# --------------------------------------------------------------------------- #
def _conv3x3_taps(x, w_ref, Himg, Wimg, Cout):
    """x: (Cin, Himg*Wimg) f32, element (ci, h*Wimg + w).
       w_ref: (9, Cout, Cin) ref; tap k = dh*3 + dw holds weight[:, :, dh, dw].
       Returns (Cout, Himg*Wimg) f32 = 3x3 conv, zero padding, stride 1, no bias.

       Each tap is a constant lane shift of the flattened image: realized as a
       static lane-offset slice of a once-concatenated zero-strip-padded copy
       (lowers to an XLU lane rotation), with the W-boundary wrap killed by a
       per-tap lane mask and the H boundary covered by the zero strips."""
    Cin = x.shape[0]
    HW = Himg * Wimg
    zstrip = jnp.zeros((Cin, Wimg + 1), jnp.float32)
    xe = jnp.concatenate([zstrip, x, zstrip], axis=1)        # (Cin, HW + 2*Wimg + 2)

    lane = lax.broadcasted_iota(jnp.int32, (1, HW), 1)
    wcol = lane % Wimg
    m_left = wcol >= 1                   # tap reads column w-1: invalid at w == 0
    m_right = wcol <= Wimg - 2           # tap reads column w+1: invalid at w == W-1

    acc = jnp.zeros((Cout, HW), jnp.float32)
    for dh in range(3):
        for dw in range(3):
            off = (dh - 1) * Wimg + (dw - 1)
            start = (Wimg + 1) + off
            tap = xe[:, start:start + HW]        # x shifted by `off`; zeros past H edges
            if dw == 0:
                tap = jnp.where(m_left, tap, 0.0)
            elif dw == 2:
                tap = jnp.where(m_right, tap, 0.0)
            acc = acc + jnp.dot(w_ref[dh * 3 + dw], tap,
                                preferred_element_type=jnp.float32)
    return acc


# --------------------------------------------------------------------------- #
# Stage 1: conv1 (3x3, pad 1, stride) + per-image BN1 partial statistics
# --------------------------------------------------------------------------- #
def _make_stage1_kernel(H, W, Cin, Cout, stride):
    def kernel(*refs):
        if stride > 1:
            x_ref, w1_ref, d_ref, c1_ref, st1_ref = refs
        else:
            x_ref, w1_ref, c1_ref, st1_ref = refs

        acc = _conv3x3_taps(x_ref[0], w1_ref, H, W, Cout)        # (Cout, H*W)
        if stride > 1:
            # strided conv == stride-1 conv followed by spatial selection
            acc = jnp.dot(acc, d_ref[...], preferred_element_type=jnp.float32)
        hw_o = acc.shape[1]

        c1_ref[...] = acc.reshape(1, Cout, hw_o)
        # one-pass BN1 partials for this image: [sum, sum of squares] per channel
        st1_ref[0:1, :, 0:1] = jnp.sum(acc, axis=1, keepdims=True).reshape(1, Cout, 1)
        st1_ref[0:1, :, 1:2] = jnp.sum(acc * acc, axis=1, keepdims=True).reshape(1, Cout, 1)

    return kernel


# --------------------------------------------------------------------------- #
# Stage 2: BN1 affine + ReLU + conv2 (3x3, pad 1, stride 1) + BN2 partial stats
# --------------------------------------------------------------------------- #
def _make_stage2_kernel(Ho, Wo, Cout):
    def kernel(c1_ref, aff1_ref, w2_ref, c2_ref, st2_ref):
        scale = aff1_ref[:, 0:1]                                 # (Cout, 1)
        shift = aff1_ref[:, 1:2]
        y = jnp.maximum(c1_ref[0] * scale + shift, 0.0)          # (Cout, Ho*Wo)

        acc = _conv3x3_taps(y, w2_ref, Ho, Wo, Cout)             # (Cout, Ho*Wo)
        c2_ref[...] = acc.reshape(1, Cout, Ho * Wo)
        st2_ref[0:1, :, 0:1] = jnp.sum(acc, axis=1, keepdims=True).reshape(1, Cout, 1)
        st2_ref[0:1, :, 1:2] = jnp.sum(acc * acc, axis=1, keepdims=True).reshape(1, Cout, 1)

    return kernel


# --------------------------------------------------------------------------- #
# Stage 3: BN2 affine + shortcut (identity or 1x1 conv from X) + ReLU
# --------------------------------------------------------------------------- #
def _make_stage3_kernel(Cout, HoWo, use_1x1conv, stride):
    def kernel(*refs):
        if use_1x1conv and stride > 1:
            c2_ref, aff2_ref, x_ref, w3_ref, b3_ref, d_ref, o_ref = refs
        elif use_1x1conv:
            c2_ref, aff2_ref, x_ref, w3_ref, b3_ref, o_ref = refs
        else:
            c2_ref, aff2_ref, x_ref, o_ref = refs

        scale = aff2_ref[:, 0:1]
        shift = aff2_ref[:, 1:2]
        y = c2_ref[0] * scale + shift                            # (Cout, Ho*Wo)

        if use_1x1conv:
            r = jnp.dot(w3_ref[...], x_ref[0],
                        preferred_element_type=jnp.float32) + b3_ref[...]
            if stride > 1:
                r = jnp.dot(r, d_ref[...], preferred_element_type=jnp.float32)
        else:
            r = x_ref[0]                                         # identity shortcut

        o_ref[...] = jnp.maximum(y + r, 0.0).reshape(1, Cout, HoWo)

    return kernel


# --------------------------------------------------------------------------- #
# Wrapper glue (tiny, per-channel / per-weight only -- no activation passes)
# --------------------------------------------------------------------------- #
def _finalize_bn(stats, gamma, beta, count):
    """stats: (N, C, 2) per-image [sum, sumsq] partials -> (C, 2) [scale, shift]."""
    s = jnp.sum(stats[:, :, 0], axis=0)
    ss = jnp.sum(stats[:, :, 1], axis=0)
    mean = s / count
    var = jnp.maximum(ss / count - mean * mean, 0.0)     # biased var (training-mode BN)
    scale = gamma * lax.rsqrt(var + EPS)
    shift = beta - mean * scale
    return jnp.stack([scale, shift], axis=1)             # (C, 2)


def _downsample_matrix(H, W, Ho, Wo, stride):
    """0/1 selection (H*W, Ho*Wo): column (ho, wo) picks source pixel (s*ho, s*wo)."""
    src = (stride * jnp.arange(Ho))[:, None] * W + stride * jnp.arange(Wo)[None, :]
    return (jnp.arange(H * W)[:, None] == src.reshape(1, Ho * Wo)).astype(jnp.float32)


def residual_forward(x_nchw, params, *, stride=1, use_1x1conv=False):
    """Pallas TPU implementation of Residual.forward. x_nchw: (N, Cin, H, W) f32."""
    w1, b1, w2, b2, w3, b3, g1, be1, g2, be2 = params
    del b1, b2   # pre-BN conv biases cancel exactly under training-mode (batch-stat) BN
    N, Cin, H, W = x_nchw.shape
    Cout = w1.shape[0]
    Ho = (H - 1) // stride + 1
    Wo = (W - 1) // stride + 1
    HW, HoWo = H * W, Ho * Wo
    if not use_1x1conv:
        assert Cin == Cout and stride == 1, (
            "identity shortcut requires in_channels == out_channels and stride == 1")

    cparams = pltpu.CompilerParams(dimension_semantics=("parallel",),
                                   vmem_limit_bytes=_pick_vmem_limit())

    # NCHW kept as-is: only free contiguous reshapes, no transposes, no padding.
    x_cm = x_nchw.reshape(N, Cin, HW).astype(jnp.float32)            # (N, Cin, H*W)
    w1t = jnp.transpose(w1, (2, 3, 0, 1)).reshape(9, Cout, Cin)      # tap-major weights
    w2t = jnp.transpose(w2, (2, 3, 0, 1)).reshape(9, Cout, Cout)
    D = _downsample_matrix(H, W, Ho, Wo, stride) if stride > 1 else None

    # ---- stage 1: conv1 + partial BN1 stats ----
    in_specs1 = [pl.BlockSpec((1, Cin, HW), lambda n: (n, 0, 0)),
                 pl.BlockSpec((9, Cout, Cin), lambda n: (0, 0, 0))]
    inputs1 = [x_cm, w1t]
    if stride > 1:
        in_specs1.append(pl.BlockSpec((HW, HoWo), lambda n: (0, 0)))
        inputs1.append(D)

    c1, st1 = pl.pallas_call(
        _make_stage1_kernel(H, W, Cin, Cout, stride),
        grid=(N,),
        out_shape=(jax.ShapeDtypeStruct((N, Cout, HoWo), jnp.float32),
                   jax.ShapeDtypeStruct((N, Cout, 2), jnp.float32)),
        in_specs=in_specs1,
        out_specs=(pl.BlockSpec((1, Cout, HoWo), lambda n: (n, 0, 0)),
                   pl.BlockSpec((1, Cout, 2), lambda n: (n, 0, 0))),
        compiler_params=cparams,
    )(*inputs1)

    count = float(N * HoWo)
    aff1 = _finalize_bn(st1, g1, be1, count)             # (Cout, 2): [scale, shift]

    # ---- stage 2: BN1 + relu + conv2 + partial BN2 stats ----
    c2, st2 = pl.pallas_call(
        _make_stage2_kernel(Ho, Wo, Cout),
        grid=(N,),
        out_shape=(jax.ShapeDtypeStruct((N, Cout, HoWo), jnp.float32),
                   jax.ShapeDtypeStruct((N, Cout, 2), jnp.float32)),
        in_specs=[pl.BlockSpec((1, Cout, HoWo), lambda n: (n, 0, 0)),
                  pl.BlockSpec((Cout, 2), lambda n: (0, 0)),
                  pl.BlockSpec((9, Cout, Cout), lambda n: (0, 0, 0))],
        out_specs=(pl.BlockSpec((1, Cout, HoWo), lambda n: (n, 0, 0)),
                   pl.BlockSpec((1, Cout, 2), lambda n: (n, 0, 0))),
        compiler_params=cparams,
    )(c1, aff1, w2t)

    aff2 = _finalize_bn(st2, g2, be2, count)

    # ---- stage 3: BN2 affine + shortcut + relu (shortcut recomputed from X) ----
    in_specs3 = [pl.BlockSpec((1, Cout, HoWo), lambda n: (n, 0, 0)),
                 pl.BlockSpec((Cout, 2), lambda n: (0, 0)),
                 pl.BlockSpec((1, Cin, HW), lambda n: (n, 0, 0))]
    inputs3 = [c2, aff2, x_cm]
    if use_1x1conv:
        in_specs3 += [pl.BlockSpec((Cout, Cin), lambda n: (0, 0)),
                      pl.BlockSpec((Cout, 1), lambda n: (0, 0))]
        inputs3 += [w3.reshape(Cout, Cin), b3.reshape(Cout, 1)]
        if stride > 1:
            in_specs3.append(pl.BlockSpec((HW, HoWo), lambda n: (0, 0)))
            inputs3.append(D)

    out_cm = pl.pallas_call(
        _make_stage3_kernel(Cout, HoWo, use_1x1conv, stride),
        grid=(N,),
        out_shape=jax.ShapeDtypeStruct((N, Cout, HoWo), jnp.float32),
        in_specs=in_specs3,
        out_specs=pl.BlockSpec((1, Cout, HoWo), lambda n: (n, 0, 0)),
        compiler_params=cparams,
    )(*inputs3)

    return out_cm.reshape(N, Cout, Ho, Wo)               # already NCHW: free reshape


# --------------------------------------------------------------------------- #
# Pure-JAX reference (mirrors the PyTorch module in training mode, NCHW)
# --------------------------------------------------------------------------- #
def residual_reference(x, params, *, stride=1, use_1x1conv=False):
    w1, b1, w2, b2, w3, b3, g1, be1, g2, be2 = params

    def conv(x, w, b, s, pad):
        y = lax.conv_general_dilated(
            x, w, window_strides=(s, s), padding=[(pad, pad), (pad, pad)],
            dimension_numbers=("NCHW", "OIHW", "NCHW"),
            precision=lax.Precision.HIGHEST)
        return y + b[None, :, None, None]

    def bn(y, g, be):
        m = jnp.mean(y, axis=(0, 2, 3), keepdims=True)
        v = jnp.mean((y - m) ** 2, axis=(0, 2, 3), keepdims=True)
        return (y - m) * lax.rsqrt(v + EPS) * g[None, :, None, None] + be[None, :, None, None]

    y = jax.nn.relu(bn(conv(x, w1, b1, stride, 1), g1, be1))
    y = bn(conv(y, w2, b2, 1, 1), g2, be2)
    if use_1x1conv:
        x = conv(x, w3, b3, stride, 0)
    return jax.nn.relu(y + x)


if __name__ == "__main__":
    def make_params(key, Cin, Cout):
        ks = jax.random.split(key, 7)
        w1 = 0.2 * jax.random.normal(ks[0], (Cout, Cin, 3, 3), jnp.float32)
        b1 = 0.1 * jax.random.normal(ks[1], (Cout,), jnp.float32)
        w2 = 0.2 * jax.random.normal(ks[2], (Cout, Cout, 3, 3), jnp.float32)
        b2 = 0.1 * jax.random.normal(ks[3], (Cout,), jnp.float32)
        w3 = 0.2 * jax.random.normal(ks[4], (Cout, Cin, 1, 1), jnp.float32)
        b3 = 0.1 * jax.random.normal(ks[5], (Cout,), jnp.float32)
        gb = 0.1 * jax.random.normal(ks[6], (4, Cout), jnp.float32)
        return (w1, b1, w2, b2, w3, b3, 1.0 + gb[0], gb[1], 1.0 + gb[2], gb[3])

    key = jax.random.PRNGKey(0)
    kx1, kp1, kx2, kp2 = jax.random.split(key, 4)

    # config 1: projection shortcut (use_1x1conv=True), Cin != Cout
    N, Cin, Cout, H, W = 2, 4, 8, 16, 16
    x1 = jax.random.normal(kx1, (N, Cin, H, W), jnp.float32)
    p1 = make_params(kp1, Cin, Cout)
    out1 = jax.block_until_ready(residual_forward(x1, p1, stride=1, use_1x1conv=True))
    ref1 = residual_reference(x1, p1, stride=1, use_1x1conv=True)
    np.testing.assert_allclose(np.asarray(out1), np.asarray(ref1), atol=2e-3, rtol=2e-3)

    # config 2: identity shortcut (use_1x1conv=False), Cin == Cout
    x2 = jax.random.normal(kx2, (N, Cout, H, W), jnp.float32)
    p2 = make_params(kp2, Cout, Cout)
    out2 = jax.block_until_ready(residual_forward(x2, p2, stride=1, use_1x1conv=False))
    ref2 = residual_reference(x2, p2, stride=1, use_1x1conv=False)
    np.testing.assert_allclose(np.asarray(out2), np.asarray(ref2), atol=2e-3, rtol=2e-3)

    print("KERNEL_OK")
</pallas_src>

<mosaic_0001>
module attributes {stable_mosaic.version = 11 : i64} {
  func.func @kernel(%arg0: i32, %arg1: memref<1x4x256xf32, #tpu.memory_space<vmem>>, %arg2: memref<9x8x4xf32, #tpu.memory_space<vmem>>, %arg3: memref<1x8x256xf32, #tpu.memory_space<vmem>>, %arg4: memref<1x8x2xf32, #tpu.memory_space<vmem>>) attributes {dimension_semantics = [#tpu.dimension_semantics<parallel>], iteration_bounds = array<i64: 2>, scalar_prefetch = 0 : i64, scratch_operands = 0 : i64, tpu.core_type = #tpu.core_type<tc>, window_params = [{transform_indices = @transform_0, window_bounds = array<i64: 1, 4, 256>}, {pipeline_mode = #tpu.pipeline_mode<synchronous>, transform_indices = @transform_1, window_bounds = array<i64: 9, 8, 4>}, {transform_indices = @transform_2, window_bounds = array<i64: 1, 8, 256>}, {transform_indices = @transform_3, window_bounds = array<i64: 1, 8, 2>}]} {
    %c0 = arith.constant 0 : index
    %c0_0 = arith.constant 0 : index
    %c0_1 = arith.constant 0 : index
    %0 = vector.load %arg1[%c0, %c0_0, %c0_1] : memref<1x4x256xf32, #tpu.memory_space<vmem>>, vector<1x4x256xf32>
    %1 = vector.shape_cast %0 : vector<1x4x256xf32> to vector<4x256xf32>
    %cst = arith.constant 0.000000e+00 : f32
    %2 = vector.broadcast %cst : f32 to vector<4x17xf32>
    %3 = tpu.concatenate %2, %1, %2 in 1 : vector<4x17xf32>, vector<4x256xf32>, vector<4x17xf32> -> vector<4x290xf32>
    %4 = tpu.iota {dimensions = array<i32: 1>} : vector<1x256xi32>
    %c16_i32 = arith.constant 16 : i32
    %c0_i32 = arith.constant 0 : i32
    %5 = arith.cmpi eq, %c16_i32, %c0_i32 : i32
    %c1_i32 = arith.constant 1 : i32
    %6 = arith.select %5, %c1_i32, %c16_i32 : i32
    %7 = vector.broadcast %6 : i32 to vector<1x256xi32>
    %8 = arith.remsi %4, %7 : vector<1x256xi32>
    %c0_i32_2 = arith.constant 0 : i32
    %9 = vector.broadcast %c0_i32_2 : i32 to vector<1x256xi32>
    %10 = arith.cmpi ne, %8, %9 : vector<1x256xi32>
    %c0_i32_3 = arith.constant 0 : i32
    %11 = vector.broadcast %c0_i32_3 : i32 to vector<1x256xi32>
    %12 = arith.cmpi slt, %8, %11 : vector<1x256xi32>
    %c0_i32_4 = arith.constant 0 : i32
    %13 = arith.cmpi slt, %6, %c0_i32_4 : i32
    %14 = vector.broadcast %13 : i1 to vector<1x256xi1>
    %15 = vector.broadcast %14 : vector<1x256xi1> to vector<1x256xi1>
    %16 = arith.xori %12, %15 : vector<1x256xi1>
    %17 = arith.andi %16, %10 : vector<1x256xi1>
    %18 = vector.broadcast %6 : i32 to vector<1x256xi32>
    %19 = arith.addi %8, %18 : vector<1x256xi32>
    %20 = arith.select %17, %19, %8 : vector<1x256xi1>, vector<1x256xi32>
    %c1_i32_5 = arith.constant 1 : i32
    %21 = vector.broadcast %c1_i32_5 : i32 to vector<1x256xi32>
    %22 = arith.cmpi sge, %20, %21 : vector<1x256xi32>
    %c14_i32 = arith.constant 14 : i32
    %23 = vector.broadcast %c14_i32 : i32 to vector<1x256xi32>
    %24 = arith.cmpi sle, %20, %23 : vector<1x256xi32>
    %cst_6 = arith.constant 0.000000e+00 : f32
    %25 = vector.broadcast %cst_6 : f32 to vector<8x256xf32>
    %26 = vector.extract_strided_slice %3 {offsets = [0, 0], sizes = [4, 256], strides = [1, 1]} : vector<4x290xf32> to vector<4x256xf32>
    %cst_7 = arith.constant 0.000000e+00 : f32
    %27 = vector.shape_cast %22 : vector<1x256xi1> to vector<1x256xi1>
    %28 = vector.broadcast %27 : vector<1x256xi1> to vector<4x256xi1>
    %29 = vector.broadcast %cst_7 : f32 to vector<4x256xf32>
    %30 = arith.select %28, %26, %29 : vector<4x256xi1>, vector<4x256xf32>
    %c0_8 = arith.constant 0 : index
    %c0_9 = arith.constant 0 : index
    %c0_10 = arith.constant 0 : index
    %31 = vector.load %arg2[%c0_8, %c0_9, %c0_10] : memref<9x8x4xf32, #tpu.memory_space<vmem>>, vector<1x8x4xf32>
    %32 = vector.shape_cast %31 : vector<1x8x4xf32> to vector<8x4xf32>
    %cst_11 = arith.constant dense<0.000000e+00> : vector<8x256xf32>
    %33 = tpu.matmul %32, %30, %cst_11 {dimension_numbers = #tpu.dot_dimension_numbers<[1], [0], [0], [1], [0, 0, 1, 1], [], []>} : vector<8x4xf32>, vector<4x256xf32>, vector<8x256xf32> -> vector<8x256xf32>
    %34 = arith.addf %25, %33 : vector<8x256xf32>
    %35 = vector.extract_strided_slice %3 {offsets = [0, 1], sizes = [4, 256], strides = [1, 1]} : vector<4x290xf32> to vector<4x256xf32>
    %c1 = arith.constant 1 : index
    %c0_12 = arith.constant 0 : index
    %c0_13 = arith.constant 0 : index
    %36 = vector.load %arg2[%c1, %c0_12, %c0_13] : memref<9x8x4xf32, #tpu.memory_space<vmem>>, vector<1x8x4xf32>
    %37 = vector.shape_cast %36 : vector<1x8x4xf32> to vector<8x4xf32>
    %cst_14 = arith.constant dense<0.000000e+00> : vector<8x256xf32>
    %38 = tpu.matmul %37, %35, %cst_14 {dimension_numbers = #tpu.dot_dimension_numbers<[1], [0], [0], [1], [0, 0, 1, 1], [], []>} : vector<8x4xf32>, vector<4x256xf32>, vector<8x256xf32> -> vector<8x256xf32>
    %39 = arith.addf %34, %38 : vector<8x256xf32>
    %40 = vector.extract_strided_slice %3 {offsets = [0, 2], sizes = [4, 256], strides = [1, 1]} : vector<4x290xf32> to vector<4x256xf32>
    %cst_15 = arith.constant 0.000000e+00 : f32
    %41 = vector.shape_cast %24 : vector<1x256xi1> to vector<1x256xi1>
    %42 = vector.broadcast %41 : vector<1x256xi1> to vector<4x256xi1>
    %43 = vector.broadcast %cst_15 : f32 to vector<4x256xf32>
    %44 = arith.select %42, %40, %43 : vector<4x256xi1>, vector<4x256xf32>
    %c2 = arith.constant 2 : index
    %c0_16 = arith.constant 0 : index
    %c0_17 = arith.constant 0 : index
    %45 = vector.load %arg2[%c2, %c0_16, %c0_17] : memref<9x8x4xf32, #tpu.memory_space<vmem>>, vector<1x8x4xf32>
    %46 = vector.shape_cast %45 : vector<1x8x4xf32> to vector<8x4xf32>
    %cst_18 = arith.constant dense<0.000000e+00> : vector<8x256xf32>
    %47 = tpu.matmul %46, %44, %cst_18 {dimension_numbers = #tpu.dot_dimension_numbers<[1], [0], [0], [1], [0, 0, 1, 1], [], []>} : vector<8x4xf32>, vector<4x256xf32>, vector<8x256xf32> -> vector<8x256xf32>
    %48 = arith.addf %39, %47 : vector<8x256xf32>
    %49 = vector.extract_strided_slice %3 {offsets = [0, 16], sizes = [4, 256], strides = [1, 1]} : vector<4x290xf32> to vector<4x256xf32>
    %cst_19 = arith.constant 0.000000e+00 : f32
    %50 = vector.shape_cast %22 : vector<1x256xi1> to vector<1x256xi1>
    %51 = vector.broadcast %50 : vector<1x256xi1> to vector<4x256xi1>
    %52 = vector.broadcast %cst_19 : f32 to vector<4x256xf32>
    %53 = arith.select %51, %49, %52 : vector<4x256xi1>, vector<4x256xf32>
    %c3 = arith.constant 3 : index
    %c0_20 = arith.constant 0 : index
    %c0_21 = arith.constant 0 : index
    %54 = vector.load %arg2[%c3, %c0_20, %c0_21] : memref<9x8x4xf32, #tpu.memory_space<vmem>>, vector<1x8x4xf32>
    %55 = vector.shape_cast %54 : vector<1x8x4xf32> to vector<8x4xf32>
    %cst_22 = arith.constant dense<0.000000e+00> : vector<8x256xf32>
    %56 = tpu.matmul %55, %53, %cst_22 {dimension_numbers = #tpu.dot_dimension_numbers<[1], [0], [0], [1], [0, 0, 1, 1], [], []>} : vector<8x4xf32>, vector<4x256xf32>, vector<8x256xf32> -> vector<8x256xf32>
    %57 = arith.addf %48, %56 : vector<8x256xf32>
    %58 = vector.extract_strided_slice %3 {offsets = [0, 17], sizes = [4, 256], strides = [1, 1]} : vector<4x290xf32> to vector<4x256xf32>
    %c4 = arith.constant 4 : index
    %c0_23 = arith.constant 0 : index
    %c0_24 = arith.constant 0 : index
    %59 = vector.load %arg2[%c4, %c0_23, %c0_24] : memref<9x8x4xf32, #tpu.memory_space<vmem>>, vector<1x8x4xf32>
    %60 = vector.shape_cast %59 : vector<1x8x4xf32> to vector<8x4xf32>
    %cst_25 = arith.constant dense<0.000000e+00> : vector<8x256xf32>
    %61 = tpu.matmul %60, %58, %cst_25 {dimension_numbers = #tpu.dot_dimension_numbers<[1], [0], [0], [1], [0, 0, 1, 1], [], []>} : vector<8x4xf32>, vector<4x256xf32>, vector<8x256xf32> -> vector<8x256xf32>
    %62 = arith.addf %57, %61 : vector<8x256xf32>
    %63 = vector.extract_strided_slice %3 {offsets = [0, 18], sizes = [4, 256], strides = [1, 1]} : vector<4x290xf32> to vector<4x256xf32>
    %cst_26 = arith.constant 0.000000e+00 : f32
    %64 = vector.shape_cast %24 : vector<1x256xi1> to vector<1x256xi1>
    %65 = vector.broadcast %64 : vector<1x256xi1> to vector<4x256xi1>
    %66 = vector.broadcast %cst_26 : f32 to vector<4x256xf32>
    %67 = arith.select %65, %63, %66 : vector<4x256xi1>, vector<4x256xf32>
    %c5 = arith.constant 5 : index
    %c0_27 = arith.constant 0 : index
    %c0_28 = arith.constant 0 : index
    %68 = vector.load %arg2[%c5, %c0_27, %c0_28] : memref<9x8x4xf32, #tpu.memory_space<vmem>>, vector<1x8x4xf32>
    %69 = vector.shape_cast %68 : vector<1x8x4xf32> to vector<8x4xf32>
    %cst_29 = arith.constant dense<0.000000e+00> : vector<8x256xf32>
    %70 = tpu.matmul %69, %67, %cst_29 {dimension_numbers = #tpu.dot_dimension_numbers<[1], [0], [0], [1], [0, 0, 1, 1], [], []>} : vector<8x4xf32>, vector<4x256xf32>, vector<8x256xf32> -> vector<8x256xf32>
    %71 = arith.addf %62, %70 : vector<8x256xf32>
    %72 = vector.extract_strided_slice %3 {offsets = [0, 32], sizes = [4, 256], strides = [1, 1]} : vector<4x290xf32> to vector<4x256xf32>
    %cst_30 = arith.constant 0.000000e+00 : f32
    %73 = vector.shape_cast %22 : vector<1x256xi1> to vector<1x256xi1>
    %74 = vector.broadcast %73 : vector<1x256xi1> to vector<4x256xi1>
    %75 = vector.broadcast %cst_30 : f32 to vector<4x256xf32>
    %76 = arith.select %74, %72, %75 : vector<4x256xi1>, vector<4x256xf32>
    %c6 = arith.constant 6 : index
    %c0_31 = arith.constant 0 : index
    %c0_32 = arith.constant 0 : index
    %77 = vector.load %arg2[%c6, %c0_31, %c0_32] : memref<9x8x4xf32, #tpu.memory_space<vmem>>, vector<1x8x4xf32>
    %78 = vector.shape_cast %77 : vector<1x8x4xf32> to vector<8x4xf32>
    %cst_33 = arith.constant dense<0.000000e+00> : vector<8x256xf32>
    %79 = tpu.matmul %78, %76, %cst_33 {dimension_numbers = #tpu.dot_dimension_numbers<[1], [0], [0], [1], [0, 0, 1, 1], [], []>} : vector<8x4xf32>, vector<4x256xf32>, vector<8x256xf32> -> vector<8x256xf32>
    %80 = arith.addf %71, %79 : vector<8x256xf32>
    %81 = vector.extract_strided_slice %3 {offsets = [0, 33], sizes = [4, 256], strides = [1, 1]} : vector<4x290xf32> to vector<4x256xf32>
    %c7 = arith.constant 7 : index
    %c0_34 = arith.constant 0 : index
    %c0_35 = arith.constant 0 : index
    %82 = vector.load %arg2[%c7, %c0_34, %c0_35] : memref<9x8x4xf32, #tpu.memory_space<vmem>>, vector<1x8x4xf32>
    %83 = vector.shape_cast %82 : vector<1x8x4xf32> to vector<8x4xf32>
    %cst_36 = arith.constant dense<0.000000e+00> : vector<8x256xf32>
    %84 = tpu.matmul %83, %81, %cst_36 {dimension_numbers = #tpu.dot_dimension_numbers<[1], [0], [0], [1], [0, 0, 1, 1], [], []>} : vector<8x4xf32>, vector<4x256xf32>, vector<8x256xf32> -> vector<8x256xf32>
    %85 = arith.addf %80, %84 : vector<8x256xf32>
    %86 = vector.extract_strided_slice %3 {offsets = [0, 34], sizes = [4, 256], strides = [1, 1]} : vector<4x290xf32> to vector<4x256xf32>
    %cst_37 = arith.constant 0.000000e+00 : f32
    %87 = vector.shape_cast %24 : vector<1x256xi1> to vector<1x256xi1>
    %88 = vector.broadcast %87 : vector<1x256xi1> to vector<4x256xi1>
    %89 = vector.broadcast %cst_37 : f32 to vector<4x256xf32>
    %90 = arith.select %88, %86, %89 : vector<4x256xi1>, vector<4x256xf32>
    %c8 = arith.constant 8 : index
    %c0_38 = arith.constant 0 : index
    %c0_39 = arith.constant 0 : index
    %91 = vector.load %arg2[%c8, %c0_38, %c0_39] : memref<9x8x4xf32, #tpu.memory_space<vmem>>, vector<1x8x4xf32>
    %92 = vector.shape_cast %91 : vector<1x8x4xf32> to vector<8x4xf32>
    %cst_40 = arith.constant dense<0.000000e+00> : vector<8x256xf32>
    %93 = tpu.matmul %92, %90, %cst_40 {dimension_numbers = #tpu.dot_dimension_numbers<[1], [0], [0], [1], [0, 0, 1, 1], [], []>} : vector<8x4xf32>, vector<4x256xf32>, vector<8x256xf32> -> vector<8x256xf32>
    %94 = arith.addf %85, %93 : vector<8x256xf32>
    %95 = vector.shape_cast %94 : vector<8x256xf32> to vector<1x8x256xf32>
    %c0_41 = arith.constant 0 : index
    %c0_42 = arith.constant 0 : index
    %c0_43 = arith.constant 0 : index
    %96 = vector.load %arg3[%c0_41, %c0_42, %c0_43] : memref<1x8x256xf32, #tpu.memory_space<vmem>>, vector<1x8x256xf32>
    tpu.vector_store %arg3[%c0_41, %c0_42, %c0_43], %95 {strides = array<i32>} : memref<1x8x256xf32, #tpu.memory_space<vmem>>, vector<1x8x256xf32>,
    %cst_44 = arith.constant dense<0.000000e+00> : vector<8xf32>
    %97 = vector.multi_reduction <add>, %94, %cst_44 [1] : vector<8x256xf32> to vector<8xf32>
    %98 = vector.shape_cast %97 : vector<8xf32> to vector<8x1xf32>
    %99 = vector.shape_cast %98 : vector<8x1xf32> to vector<1x8x1xf32>
    %c0_45 = arith.constant 0 : index
    %c0_46 = arith.constant 0 : index
    %c0_47 = arith.constant 0 : index
    %100 = vector.load %arg4[%c0_45, %c0_46, %c0_47] : memref<1x8x2xf32, #tpu.memory_space<vmem>>, vector<1x8x1xf32>
    tpu.vector_store %arg4[%c0_45, %c0_46, %c0_47], %99 {strides = array<i32>} : memref<1x8x2xf32, #tpu.memory_space<vmem>>, vector<1x8x1xf32>,
    %101 = arith.mulf %94, %94 : vector<8x256xf32>
    %cst_48 = arith.constant dense<0.000000e+00> : vector<8xf32>
    %102 = vector.multi_reduction <add>, %101, %cst_48 [1] : vector<8x256xf32> to vector<8xf32>
    %103 = vector.shape_cast %102 : vector<8xf32> to vector<8x1xf32>
    %104 = vector.shape_cast %103 : vector<8x1xf32> to vector<1x8x1xf32>
    %c0_49 = arith.constant 0 : index
    %c0_50 = arith.constant 0 : index
    %c1_51 = arith.constant 1 : index
    %105 = vector.load %arg4[%c0_49, %c0_50, %c1_51] : memref<1x8x2xf32, #tpu.memory_space<vmem>>, vector<1x8x1xf32>
    tpu.vector_store %arg4[%c0_49, %c0_50, %c1_51], %104 {strides = array<i32>} : memref<1x8x2xf32, #tpu.memory_space<vmem>>, vector<1x8x1xf32>,
    return
  }
  func.func @transform_0(%arg0: i32) -> (i32, i32, i32) {
    %c0_i32 = arith.constant 0 : i32
    %c0_i32_0 = arith.constant 0 : i32
    %c0_i32_1 = arith.constant 0 : i32
    return %arg0, %c0_i32, %c0_i32_0 : i32, i32, i32
  }
  func.func @transform_1(%arg0: i32) -> (i32, i32, i32) {
    %c0_i32 = arith.constant 0 : i32
    %c0_i32_0 = arith.constant 0 : i32
    %c0_i32_1 = arith.constant 0 : i32
    %c0_i32_2 = arith.constant 0 : i32
    return %c0_i32, %c0_i32_0, %c0_i32_1 : i32, i32, i32
  }
  func.func @transform_2(%arg0: i32) -> (i32, i32, i32) {
    %c0_i32 = arith.constant 0 : i32
    %c0_i32_0 = arith.constant 0 : i32
    %c0_i32_1 = arith.constant 0 : i32
    return %arg0, %c0_i32, %c0_i32_0 : i32, i32, i32
  }
  func.func @transform_3(%arg0: i32) -> (i32, i32, i32) {
    %c0_i32 = arith.constant 0 : i32
    %c0_i32_0 = arith.constant 0 : i32
    %c0_i32_1 = arith.constant 0 : i32
    return %arg0, %c0_i32, %c0_i32_0 : i32, i32, i32
  }
}

</mosaic_0001>

<bundles_post_ra>
// kernel: tpu_custom_call.1
= control target key start
LH: loop header
LB: loop body
LE: loop exit
PB: predicated region body
PF: predicated region fallthrough
CT: control target
= control target key end

     0   :  { %9 = vsyncpa [#allocation3], 0  ;;  %s1641_s0 = inlined_call_operand.vmem [shape: f32[2,4,256], index: 0, kind: input, shape index: {}]   ;;  %s1642_s1 = inlined_call_operand.vmem [shape: f32[9,8,4], index: 1, kind: input, shape index: {}]   ;;  %s1643_s2 = inlined_call_operand.hbm [shape: f32[2,8,256], index: 2, kind: output, shape index: {0}]   ;;  %s1644_s3 = inlined_call_operand.vmem [shape: f32[2,8,2], index: 3, kind: output, shape index: {1}]  }
   0x1   :  { %11 = vsyncpa [#allocation3 + $0x1], 0  ;;  %s1406_s12 = smov 0   ;;  %s1408_s13 = smov 0  }
   0x2   :  { %s1410_s14 = smov 0   ;;  %s1412_s15 = smov 0  }
   0x3 LB: > { %s1427_s16 = sadd.s32 4294967295, %s1373_s15   ;;  %s1195_s17 = sadd.s32 4294967294, %s1373_s15   ;;  %s1373_s15 = sphi %s1412_s15, %s1658_s15   ;;  %s1369_s14 = sphi %s1410_s14, %s1657_s14   ;;  %s1365_s13 = sphi %s1408_s13, %s1656_s13   ;;  %s1361_s12 = sphi %s1406_s12, %s1655_s12  }
   0x4   : > { %s1431_s18 = sadd.s32 1, %s1373_s15   ;;  %s71_s19 = sadd.s32 1, %s1369_s14 }
   0x5   : > { %s68_s20 = ssub.s32 %s1373_s15, %s1431_s18  ;;  %p81_p0 = scmp.ne.s32.totalorder %s1369_s14, %s1365_s13 }
   0x6   : > { %p69_p1 = scmp.eq.s32.totalorder %s68_s20, 0  ;;  %p82_p2 = scmp.eq.s32.totalorder %s1427_s16, 1 }
   0x7   : > { %p87_p3 = scmp.ne.s32.totalorder %s1365_s13, %s1361_s12  ;;  %p88_p4 = scmp.eq.s32.totalorder %s1195_s17, 1 }
   0x8   : > { %s1442_s21 = scalar_select %p69_p1, %s1369_s14, %s71_s19  }
   0x9   : > { %p1444_p5 = por %p82_p2, %p81_p0  ;;  %p1448_p6 = por %p88_p4, %p87_p3 }
   0xa   : > { %p1198_p7 = scmp.ge.s32.totalorder %s1373_s15, 1  ;;  %p143_p8 = scmp.lt.s32.totalorder %s1373_s15, 3 }
   0xc   : > { %p144_p9 = pnand %p1198_p7, %p143_p8 }
   0xd   : > { %p171_p10 = scmp.lt.s32.totalorder (!%p144_p9), %s1427_s16, 1  ;;  %s1375_s29 = smov (!%p144_p9), 17   ;;  %vm187_vm0 = vcmask (!%p144_p9), 138240   ;;  %v1380_v4 = vmov (!%p144_p9), 0.0   ;;  %v194_v12 = vlaneseq (!%p144_p9)  ;;  %vm249_vm1 = vcmask (!%p144_p9), 1043456   ;;  %v1218_v24 = vld [vmem:[%s1642_s1 + $0x20] sm:$0xff] (!%p144_p9) }
   0xe   : > { %147 = sbr.rel (%p144_p9) target bundleno = 671 (0x29f), region = 28  ;;  %s1376_s30 = smov (!%p144_p9), 110   ;;  %685 = vmatprep.mubr.f32.mxu0 (!%p144_p9), %v1380_v4  ;;  %318 = vmatprep.mubr.f32.mxu1 (!%p144_p9), %v1380_v4  ;;  %vm611_vm2 = vcmask (!%p144_p9), 908288   ;;  %vm245_vm3 = vcmask (!%p144_p9), 31744   ;;  %vm700_vm4 = vcmask (!%p144_p9), 900096   ;;  %vm242_vm7 = vcmask (!%p144_p9), 1039360  }
   0xf   : > { %s1377_s4 = smov (!%p144_p9), 111   ;;  %s1378_s5 = smov (!%p144_p9), 96   ;;  %v195_v15 = vand.u32 (!%p144_p9), 127, %v194_v12  ;;  %v1203_v40 = vld [vmem:[%s1642_s1 + $0x8] sm:$0xff] (!%p144_p9)  ;;  %vm797_vm10 = vcmask (!%p144_p9), 785408   ;;  %vm415_vm11 = vcmask (!%p144_p9), 1031168  }
  0x10   : > { %s1379_s6 = smov (!%p144_p9), 127   ;;  %s1381_s7 = smov (!%p144_p9), 95   ;;  %v1222_v41 = vld [vmem:[%s1642_s1 + $0x28] sm:$0xff] (!%p144_p9)  ;;  %v231_v54 = vld [vmem:[%s1642_s1] sm:$0xff] (!%p144_p9)  ;;  %vm896_vm12 = vcmask (!%p144_p9), 777216   ;;  %v1226_v56 = vld [vmem:[%s1642_s1 + $0x30] sm:$0xff] (!%p144_p9) }
  0x11   : > { %s1382_s8 = smov (!%p144_p9), 126   ;;  %s1383_s9 = smov (!%p144_p9), 112   ;;  %v196_v18 = vadd.s32 (!%p144_p9), 128, %v195_v15  ;;  %v201_v22 = vand.u32 (!%p144_p9), 15, %v195_v15  ;;  %vm512_vm13 = vcmask (!%p144_p9), 916480   ;;  %vm985_vm14 = vcmask (!%p144_p9), 769024  }
  0x12   : > { %s1384_s10 = smov (!%p144_p9), 94   ;;  %v1214_v12 = vld [vmem:[%s1642_s1 + $0x18] sm:$0xff] (!%p144_p9)  ;;  %s162_s19 = sand.u32 (!%p144_p9), 1, %s1365_s13  }
  0x13   : > { %v208_v23 = vand.u32 (!%p144_p9), 15, %v196_v18  ;;  %vm1496_vm5 = vcmp.le.s32.totalorder (!%p144_p9), %v201_v22, 14  ;;  %vm1516_vm9 = vcmp.ge.s32.totalorder (!%p144_p9), %v201_v22, 1  ;;  %s1199_s20 = sshll.u32 (!%p144_p9), %s162_s19, 4  ;;  %s1244_s27 = sshll.u32 (!%p144_p9), %s1427_s16, 8 }
  0x14   : > { %s164_s26 = scalar_lea.vmem (!%p144_p9), [#allocation2], %s1199_s20 }
  0x15   : > { %s1456_s24 = scalar_select %p171_p10, %s1427_s16, 1  ;;  %vm1500_vm6 = vcmp.le.s32.totalorder %v208_v23, 14  ;;  %vm1512_vm8 = vcmp.ge.s32.totalorder %v208_v23, 1 }
  0x17   : > { %s1243_s25 = sshll.u32 %s1456_s24, 3 }
  0x18   : > { %s175_s28 = scalar_lea.vmem %s1641_s0, %s1243_s25 }
  0x19   : > { %v180_v0 = vld [vmem:[%s175_s28] sm:$0xff]  ;;  %s1109_s28 = sshll.u32 %s164_s26, 4  ;;  %s1110_s28 = int_to_ptr.vmem [resolvable:$true] %s1109_s28 }
  0x1a   : > { %183 = vrot.lane.b32.xlu0 %v180_v0, %s1375_s29  ;;  %v182_v1 = vcombine.high %v180_v0, %v180_v0 }
  0x1e   : > { %185 = vrot.lane.b32.xlu0 %v182_v1, %s1375_s29 }
  0x8c   : > { %v184_v2 = vpop.permute.xlu0 %183 }
  0x8d   : > { %v1465_v3 = vsel %vm187_vm0, 0.0, %v184_v2 }
  0x8e   : > { %694 = vrot.lane.b32.xlu1 %v1465_v3, %s1376_s30  ;;  %605 = vrot.lane.b32.xlu0 %v1465_v3, %s1377_s4  ;;  %v229_v45 = vsel %vm1516_vm9, %v1465_v3, 0.0 }
  0x90   : > { %v186_v5 = vpop.permute.xlu0 %185 }
  0x91   : > { %v193_v6 = vsel %vm187_vm0, %v186_v5, 0.0  ;;  %v1477_v7 = vsel %vm187_vm0, %v184_v2, %v186_v5  ;;  %v1210_v2 = vld [vmem:[%s1642_s1 + $0x10] sm:$0xff] }
  0x92   : > { %791 = vrot.lane.b32.xlu1 %v1465_v3, %s1378_s5  ;;  %236 = vrot.lane.b32.xlu0 %v1465_v3, %s1379_s6  ;;  %v230_v42 = vsel %vm1512_vm8, %v1477_v7, 0.0 }
  0x96   : > { %890 = vrot.lane.b32.xlu1 %v1465_v3, %s1381_s7  ;;  %409 = vrot.lane.b32.xlu0 %v1465_v3, %s1382_s8 }
  0x9a   : > { %698 = vrot.lane.b32.xlu0 %v193_v6, %s1376_s30  ;;  %607 = vrot.lane.b32.xlu1 %v1477_v7, %s1377_s4 }
  0x9e   : > { %240 = vrot.lane.b32.xlu0 %v193_v6, %s1379_s6  ;;  %609 = vrot.lane.b32.xlu1 %v193_v6, %s1377_s4  ;;  %s1600_s4 = scalar_lea.hbm %s1643_s2, %s1244_s27 }
  0xa2   : > { %795 = vrot.lane.b32.xlu0 %v193_v6, %s1378_s5  ;;  %696 = vrot.lane.b32.xlu1 %v1477_v7, %s1376_s30 }
  0xa6   : > { %411 = vrot.lane.b32.xlu0 %v1477_v7, %s1382_s8  ;;  %238 = vrot.lane.b32.xlu1 %v1477_v7, %s1379_s6  ;;  %s1311_s6 = scalar_lea.vmem %s1110_s28, 256 }
  0xa7   : > { %p1312_p11 = scmp.ne.s32.totalorder %s1110_s28, %s1311_s6 }
  0xa9   : > { %p1313_p12 = pnand %p1312_p11, %p1444_p5 }
  0xaa   : > { %894 = vrot.lane.b32.xlu0 %v193_v6, %s1381_s7  ;;  %793 = vrot.lane.b32.xlu1 %v1477_v7, %s1378_s5  ;;  %s1091_s5 = scalar_lea.sflag [#allocation3], %s162_s19 }
  0xab   : > { %p1314_p13 = pneg %p1313_p12 }
  0xae   : > { %508 = vrot.lane.b32.xlu0 %v1477_v7, %s1383_s9  ;;  %413 = vrot.lane.b32.xlu1 %v193_v6, %s1382_s8 }
  0xb2   : > { %981 = vrot.lane.b32.xlu0 %v1477_v7, %s1384_s10  ;;  %892 = vrot.lane.b32.xlu1 %v1477_v7, %s1381_s7  ;;  %s1385_s7 = smov [#allocation2]  }
  0xb3   : > { %s1315_s8 = sshll.u32 %s1385_s7, 4  ;;  %s1316_s8 = int_to_ptr.vmem [resolvable:$false] %s1315_s8 }
  0xb4   : > { %p1318_p0 = scmp.lt.s32.totalorder %s1110_s28, %s1316_s8 }
  0xb6   : > { %506 = vrot.lane.b32.xlu0 %v1465_v3, %s1383_s9  ;;  %510 = vrot.lane.b32.xlu1 %v193_v6, %s1383_s9  ;;  %s1317_s9 = scalar_lea.vmem %s1316_s8, 512 }
  0xb7   : > { %p1319_p1 = scmp.lt.s32.totalorder %s1317_s9, %s1311_s6 }
  0xb9   : > { %p1320_p2 = por %p1319_p1, %p1318_p0 }
  0xba   : > { %983 = vrot.lane.b32.xlu1 %v193_v6, %s1384_s10  ;;  %v1230_v6 = vld [vmem:[%s1642_s1 + $0x38] sm:$0xff] }
  0xbb   : > { %p1321_p3 = pnand %p1320_p2, %p1314_p13 }
  0xbe   : > { %979 = vrot.lane.b32.xlu1 %v1465_v3, %s1384_s10 }
 0x100   : > { %v695_v8 = vpop.permute.xlu1 %694  ;;  %v606_v9 = vpop.permute.xlu0 %605 }
 0x104   : > { %v792_v10 = vpop.permute.xlu1 %791  ;;  %v237_v11 = vpop.permute.xlu0 %236 }
 0x108   : > { %v1489_v13 = vpop.permute.xlu1 %890  ;;  %v410_v14 = vpop.permute.xlu0 %409 }
 0x10c   : > { %v608_v16 = vpop.permute.xlu1 %607  ;;  %v699_v17 = vpop.permute.xlu0 %698 }
 0x10d   : > { %v612_v25 = vsel %vm611_vm2, %v606_v9, %v608_v16 }
 0x110   : > { %v610_v19 = vpop.permute.xlu1 %609  ;;  %v241_v20 = vpop.permute.xlu0 %240 }
 0x111   : > { %v613_v21 = vsel %vm611_vm2, %v608_v16, %v610_v19 }
 0x112   : > { %1219 = vmatprep.subr.msk.mxu0 %vm249_vm1, %v613_v21 }
 0x113   : > { %1220 = vmatpush1.msk.msra.mxu0 %vm249_vm1, %v612_v25 }
 0x114   : > { %v697_v28 = vpop.permute.xlu1 %696  ;;  %1221 = vmatmul.mubr.msk.f32.vlgmr.msra.gmra.mrb[0].mxu0 %vm245_vm3, %v1218_v24  ;;  %v796_v29 = vpop.permute.xlu0 %795 }
 0x115   : > { %v701_v30 = vsel %vm700_vm4, %v695_v8, %v697_v28  ;;  %v702_v31 = vsel %vm700_vm4, %v697_v28, %v699_v17  ;;  %782 = vmatprep.mubr.f32.mxu0 %v1380_v4 }
 0x116   : > { %v705_v32 = vsel %vm1496_vm5, %v701_v30, 0.0  ;;  %v706_v33 = vsel %vm1500_vm6, %v702_v31, 0.0 }
 0x117   : > { %1223 = vmatprep.subr.msk.mxu0 %vm249_vm1, %v706_v33 }
 0x118   : > { %v239_v34 = vpop.permute.xlu1 %238  ;;  %1224 = vmatpush1.msk.msra.mxu0 %vm249_vm1, %v705_v32  ;;  %v412_v35 = vpop.permute.xlu0 %411 }
 0x119   : > { %v244_v37 = vsel %vm242_vm7, %v239_v34, %v241_v20  ;;  %v243_v38 = vsel %vm242_vm7, %v237_v11, %v239_v34  ;;  %v416_v52 = vsel %vm415_vm11, %v410_v14, %v412_v35  ;;  %v1234_v14 = vld [vmem:[%s1642_s1 + $0x40] sm:$0xff] }
 0x11a   : > { %1204 = vmatprep.subr.msk.mxu1 %vm249_vm1, %v244_v37  ;;  %v420_v57 = vsel %vm1496_vm5, %v416_v52, 0.0 }
 0x11b   : > { %1205 = vmatpush1.msk.msra.mxu1 %vm249_vm1, %v243_v38 }
 0x11c   : > { %v794_v43 = vpop.permute.xlu1 %793  ;;  %1206 = vmatmul.mubr.msk.f32.vlgmr.msra.gmra.mrb[0].mxu1 %vm245_vm3, %v1203_v40  ;;  %1207 = vmatprep.subr.msk.mxu1 %vm249_vm1, %v230_v42  ;;  %v895_v44 = vpop.permute.xlu0 %894 }
 0x11d   : > { %v798_v46 = vsel %vm797_vm10, %v792_v10, %v794_v43  ;;  %v799_v47 = vsel %vm797_vm10, %v794_v43, %v796_v29  ;;  %1225 = vmatmul.mubr.msk.f32.vlgmr.msra.gmra.mrb[0].mxu0 %vm245_vm3, %v1222_v41  ;;  %1208 = vmatpush1.msk.msra.mxu1 %vm249_vm1, %v229_v45 }
 0x11e   : > { %v802_v48 = vsel %vm1516_vm9, %v798_v46, 0.0  ;;  %v803_v49 = vsel %vm1512_vm8, %v799_v47, 0.0  ;;  %398 = vmatprep.mubr.f32.mxu1 %v1380_v4  ;;  %879 = vmatprep.mubr.f32.mxu0 %v1380_v4 }
 0x11f   : > { %1227 = vmatprep.subr.msk.mxu0 %vm249_vm1, %v803_v49 }
 0x120   : > { %v414_v50 = vpop.permute.xlu1 %413  ;;  %1228 = vmatpush1.msk.msra.mxu0 %vm249_vm1, %v802_v48  ;;  %v509_v51 = vpop.permute.xlu0 %508 }
 0x121   : > { %v417_v53 = vsel %vm415_vm11, %v412_v35, %v414_v50 }
 0x122   : > { %v421_v55 = vsel %vm1500_vm6, %v417_v53, 0.0 }
 0x123   : > { %1211 = vmatprep.subr.msk.mxu1 %vm249_vm1, %v421_v55 }
 0x124   : > { %v893_v58 = vpop.permute.xlu1 %892  ;;  %1209 = vmatmul.mubr.msk.f32.vlgmr.msra.gmra.mrb[0].mxu1 %vm245_vm3, %v231_v54  ;;  %v982_v59 = vpop.permute.xlu0 %981 }
 0x125   : > { %v897_v60 = vsel %vm896_vm12, %v1489_v13, %v893_v58  ;;  %v898_v61 = vsel %vm896_vm12, %v893_v58, %v895_v44  ;;  %1212 = vmatpush1.msk.msra.mxu1 %vm249_vm1, %v420_v57  ;;  %1229 = vmatmul.mubr.msk.f32.vlgmr.msra.gmra.mrb[0].mxu0 %vm245_vm3, %v1226_v56 }
 0x126   : > { %1231 = vmatprep.subr.msk.mxu0 %vm249_vm1, %v898_v61  ;;  %497 = vmatprep.mubr.f32.mxu1 %v1380_v4 }
 0x127   : > { %1232 = vmatpush1.msk.msra.mxu0 %vm249_vm1, %v897_v60  ;;  %970 = vmatprep.mubr.f32.mxu0 %v1380_v4 }
 0x128   : > { %v511_v62 = vpop.permute.xlu1 %510  ;;  %v507_v63 = vpop.permute.xlu0 %506 }
 0x129   : > { %v514_v0 = vsel %vm512_vm13, %v509_v51, %v511_v62  ;;  %v513_v1 = vsel %vm512_vm13, %v507_v63, %v509_v51 }
 0x12a   : > { %v518_v3 = vsel %vm1512_vm8, %v514_v0, 0.0  ;;  %v517_v5 = vsel %vm1516_vm9, %v513_v1, 0.0 }
 0x12b   : > { %1215 = vmatprep.subr.msk.mxu1 %vm249_vm1, %v518_v3 }
 0x12c   : > { %v984_v7 = vpop.permute.xlu1 %983  ;;  %1213 = vmatmul.mubr.msk.f32.vlgmr.msra.gmra.mrb[0].mxu1 %vm245_vm3, %v1210_v2 }
 0x12d   : > { %v987_v8 = vsel %vm985_vm14, %v982_v59, %v984_v7  ;;  %1216 = vmatpush1.msk.msra.mxu1 %vm249_vm1, %v517_v5  ;;  %1233 = vmatmul.mubr.msk.f32.vlgmr.msra.gmra.mrb[0].mxu0 %vm245_vm3, %v1230_v6 }
 0x12e   : > { %v991_v9 = vsel %vm1500_vm6, %v987_v8, 0.0  ;;  %594 = vmatprep.mubr.f32.mxu1 %v1380_v4  ;;  %1067 = vmatprep.mubr.f32.mxu0 %v1380_v4 }
 0x12f   : > { %1235 = vmatprep.subr.msk.mxu0 %vm249_vm1, %v991_v9 }
 0x130   : > { %v980_v10 = vpop.permute.xlu1 %979 }
 0x131   : > { %v986_v11 = vsel %vm985_vm14, %v980_v10, %v982_v59 }
 0x132   : > { %v990_v13 = vsel %vm1496_vm5, %v986_v11, 0.0 }
 0x133   : > { %1236 = vmatpush1.msk.msra.mxu0 %vm249_vm1, %v990_v13 }
 0x134   : > { %1217 = vmatmul.mubr.msk.f32.vlgmr.msra.gmra.mrb[0].mxu1 %vm245_vm3, %v1214_v12 }
 0x135   : > { %1237 = vmatmul.mubr.msk.f32.vlgmr.msra.gmra.mrb[0].mxu0 %vm245_vm3, %v1234_v14 }
 0x207   : > { %v596_v4 = vpop.f32.mrb[0].mxu1 }
 0x208   : > { %v1069_v15 = vpop.f32.mrb[0].mxu0  ;;  %v598_v16 = vpop.f32.mrb[1].mxu1 }
 0x209   : > { %v1245_v17 = vadd.f32 %v1069_v15, %v596_v4  ;;  %v1071_v18 = vpop.f32.mrb[1].mxu0 }
 0x20a   : > { %v1246_v19 = vadd.f32 %v1071_v18, %v598_v16 }
 0x20b   : > { %1076 = vst [vmem:[%s164_s26] sm:$0xff] %v1245_v17  ;;  %v1083_v20 = vmul.f32 %v1245_v17, %v1245_v17 }
 0x20c   : > { %1077 = vst [vmem:[%s164_s26 + $0x8] sm:$0xff] %v1246_v19  ;;  %v1078_v21 = vadd.f32 %v1246_v19, %v1245_v17  ;;  %v1084_v22 = vmul.f32 %v1246_v19, %v1246_v19 }
 0x20e   : > { %1079 = vadd.xlane.f32.xlu0 %v1078_v21  ;;  %v1085_v23 = vadd.f32 %v1084_v22, %v1083_v20 }
 0x210   : > { %1086 = vadd.xlane.f32.xlu1 %v1085_v23 }
 0x211   : > { %1324 = shalt.err (!%p1321_p3)
}
 0x212   : > { %s1325_s16 = scalar_lea.hbm %s1600_s4, 256  ;;  %s1329_s17 = scalar_lea.hbm %s1643_s2, 512 }
 0x213   : > { %p1326_p4 = scmp.ne.s32.totalorder %s1600_s4, %s1325_s16  ;;  %p1330_p9 = scmp.lt.u32.totalorder %s1600_s4, %s1643_s2 }
 0x214   : > { %p1331_p10 = scmp.lt.u32.totalorder %s1329_s17, %s1325_s16  ;;  %p1333_p12 = scmp.lt.u32.totalorder %s1325_s16, %s1600_s4 }
 0x215   : > { %p1327_p7 = pnand %p1326_p4, %p1444_p5 }
 0x216   : > { %p1332_p11 = por %p1331_p10, %p1330_p9 }
 0x217   : > { %p1328_p8 = pneg %p1327_p7 }
 0x218   : > { %p1334_p13 = por %p1333_p12, %p1332_p11 }
 0x21a   : > { %p1335_p0 = pnand %p1334_p13, %p1328_p8 }
 0x21c   : > { %1338 = shalt.err (!%p1335_p0)
}
 0x21d   : > { %1261 = dma.vmem_to_hbm [thread:$0]  (%p1444_p5), %s1110_s28, 256, %s1600_s4, %s1091_s5   ;;  %vm1081_vm15 = vcmask 7168   ;;  %vm1088_vm0 = vcmask 15368  }
 0x21e   : > { %s179_s29 = scalar_lea.vmem %s1644_s3, %s1243_s25 }
 0x29b   : > { %v1080_v24 = vpop.xlane.xlu0 %1079 }
 0x29c   : > { %1082 = vst.msk [vmem:[%s179_s29] sm:$0xff] %vm1081_vm15, %v1080_v24 }
 0x29d   : > { %v1087_v25 = vpop.xlane.xlu1 %1086 }
 0x29e   : > { %1089 = vst.msk [vmem:[%s179_s29] sm:$0xff] %vm1088_vm0, %v1087_v25 }
 0x29f PF: > { %p1267_p1 = scmp.ge.s32.totalorder %s1373_s15, 2  ;;  %s1124_s22 = sand.u32 1, %s1361_s12  }
 0x2a0   : > { %s1125_s28 = scalar_lea.sflag [#allocation3], %s1124_s22 }
 0x2a1   : > { %p1264_p2 = pnand %p1267_p1, %p1448_p6 }
 0x2a3   : > { %1356 = dma.done.wait (!%p1264_p2), %s1125_s28, 256  }
 0x2a4   : > { %1358 = vsyncadd (!%p1264_p2), %s1125_s28, 4294967040  ;;  %p14_p5 = scmp.ge.s32.totalorder %s1431_s18, 4   ;;  %s1655_s12 = smov %s1365_s13 }
 0x2a5   : > { %s1656_s13 = smov %s1369_s14  ;;  %s1657_s14 = smov %s1442_s21 }
 0x2a6   : > { %s1658_s15 = smov %s1431_s18  ;;  %16 = sbr.rel (!%p14_p5) target bundleno = 3 (0x3), region = 83 }
 0x2ad   :  { %1137 = vsyncpa [#allocation3], 1 }
 0x2ae   :  { %1139 = vsyncpa [#allocation3 + $0x1], 1 }

</bundles_post_ra>
